<compile_context>
chip_gen: v7x
topology: tpu7x:2x2x1
jax: 0.10.0
libtpu: 0.0.40
codegen_flags: <defaults>
</compile_context>

<pallas_src>
import functools

import jax
import jax.numpy as jnp
from jax.experimental import pallas as pl
from jax.experimental.pallas import tpu as pltpu

LRELU_SLOPE = 0.1
_VMEM_LIMIT_BYTES = 32 * 1024 * 1024   # fits v5e/v6e (128 MiB) and v7x (64 MiB physical)
_TILE_BUDGET_BYTES = 4 * 1024 * 1024   # x + out + f32 acc budget per time tile
_T_CAP_MAX = 2048
_T_CAP_MIN = 256


def _cdiv(a, b):
    return -(-a // b)


def _round_up(a, m):
    return _cdiv(a, m) * m


# ----------------------------------------------------------------------------- kernel
def _conv_block_kernel(x_ref, w_ref, b_ref, o_ref, *, t_tile, kq, slope, apply_act):
    """One grid step = one (channel-block, batch/time-tile) output block.

    x_ref : (t_win, CK)        bf16  phase-merged input strip, t_win = t_tile + kq - 1
    w_ref : (kq, CK, Co_blk)   bf16  per-tap weights, contraction ordered (phase, channel)
    b_ref : (1, Co_blk)        f32   bias
    o_ref : (t_tile, Co_blk)   bf16/f32 output block (written exactly once)
    """
    acc = jnp.dot(x_ref[pl.ds(0, t_tile), :], w_ref[0],
                  preferred_element_type=jnp.float32)
    for q in range(1, kq):                      # static unroll: taps chained into one acc
        acc = acc + jnp.dot(x_ref[pl.ds(q, t_tile), :], w_ref[q],
                            preferred_element_type=jnp.float32)
    y = acc + b_ref[...]                        # (1, Co) broadcasts over (t_tile, Co)
    if apply_act:
        y = jnp.where(y > 0, y, slope * y)
    o_ref[...] = y.astype(o_ref.dtype)


# ----------------------------------------------------------------------------- packing
def _pick_n_cb(c_in, c_out, groups, blk=128):
    """Largest channel-block count keeping blocks >=128, 128-aligned, group-aligned."""
    best = 1
    for n in range(1, groups + 1):
        if groups % n or c_in % n or c_out % n:
            continue
        ci, co = c_in // n, c_out // n
        if ci >= blk and co >= blk and ci % blk == 0 and co % blk == 0:
            best = n
    return best


def _time_cap(ck, co_blk):
    row_bytes = 2 * ck + 2 * co_blk + 4 * co_blk      # x (bf16) + out (bf16) + f32 acc
    cap = _TILE_BUDGET_BYTES // row_bytes
    cap = (cap // 16) * 16
    return max(_T_CAP_MIN, min(_T_CAP_MAX, cap))


def pack_conv_layer(w, b, stride, padding, groups, *, compute_dtype=jnp.bfloat16):
    """One-time packing: block-diagonal, phase-merged per-tap weights (bf16)."""
    C_out, ci_g, K = w.shape
    C_in = ci_g * groups
    s = stride
    Kq = _cdiv(K, s)

    if C_in == 1 and groups == 1:
        # Layer 0: im2col — the K taps become the contraction, one matmul per tile.
        W = jnp.transpose(w[:, 0, :], (1, 0)).reshape(1, 1, K, C_out)
        bias = b.reshape(1, 1, C_out).astype(jnp.float32)
        return dict(mode="im2col", W=W.astype(compute_dtype), bias=bias,
                    K=K, stride=s, padding=padding, Kq=1, CK=K,
                    n_blk=1, n_icb=1, grouped=False, Ci_blk=1,
                    C_in=C_in, C_out=C_out, C_out_stored=C_out, Co_blk=C_out,
                    t_cap=_time_cap(K, C_out))

    n_cb = _pick_n_cb(C_in, C_out, groups)
    gpb = groups // n_cb
    co_g = C_out // groups
    Ci_blk = C_in // n_cb
    Co_blk = C_out // n_cb
    CK = s * Ci_blk

    # Block-diagonal expansion only *within* each channel block.
    w_g = w.reshape(n_cb, gpb, co_g, ci_g, K)
    eye = jnp.eye(gpb, dtype=w.dtype)
    W_blk = jnp.einsum("cgbak,gh->cgahbk", w_g, eye).reshape(n_cb, Ci_blk, Co_blk, K)

    # Phase-merge: tap k = q*s + r, contraction ordered (r, ci) to match the input layout.
    W_pad = jnp.pad(W_blk, ((0, 0), (0, 0), (0, 0), (0, s * Kq - K)))
    W_taps = (W_pad.reshape(n_cb, Ci_blk, Co_blk, Kq, s)
              .transpose(0, 3, 4, 1, 2)                 # (n_cb, Kq, s, Ci_blk, Co_blk)
              .reshape(n_cb, Kq, CK, Co_blk))
    bias = b.reshape(n_cb, 1, Co_blk).astype(jnp.float32)
    n_blk, n_icb, grouped = n_cb, n_cb, True

    # Dense (groups==1) layers with big C_out: split output channels -> 2 parallel grid
    # units on v7x and a halved weight block against its 64 MiB VMEM.
    if groups == 1 and n_cb == 1 and C_out >= 1024:
        n_ob = 2
        Co_blk = C_out // n_ob
        W_taps = (W_taps.reshape(Kq, CK, n_ob, Co_blk)
                  .transpose(2, 0, 1, 3))               # (n_ob, Kq, CK, Co_blk)
        bias = b.reshape(n_ob, 1, Co_blk).astype(jnp.float32)
        n_blk, n_icb, grouped = n_ob, 1, False

    # Lane-dense stores for tiny C_out (conv_post): pad output channels to 128.
    C_out_stored = C_out
    if C_out < 64:
        assert n_blk == 1
        padc = 128 - Co_blk
        W_taps = jnp.pad(W_taps, ((0, 0), (0, 0), (0, 0), (0, padc)))
        bias = jnp.pad(bias, ((0, 0), (0, 0), (0, padc)))
        Co_blk = 128
        C_out_stored = 128

    return dict(mode="poly", W=W_taps.astype(compute_dtype), bias=bias,
                K=K, stride=s, padding=padding, Kq=Kq, CK=CK,
                n_blk=n_blk, n_icb=n_icb, grouped=grouped, Ci_blk=Ci_blk,
                C_in=C_in, C_out=C_out, C_out_stored=C_out_stored, Co_blk=Co_blk,
                t_cap=_time_cap(CK, Co_blk))


# ----------------------------------------------------------------------------- conv wrapper
def conv1d_pallas(x, layer, *, apply_act, out_dtype=jnp.bfloat16,
                  compute_dtype=jnp.bfloat16):
    """Grouped Conv1d (+ optional leaky relu). x: (B, T, C_in) NLC -> (B, t_out, C_out)."""
    B, T, C_in = x.shape
    assert C_in == layer["C_in"]
    s, K, pad = layer["stride"], layer["K"], layer["padding"]
    Kq, CK = layer["Kq"], layer["CK"]
    n_blk, n_icb, Ci_blk = layer["n_blk"], layer["n_icb"], layer["Ci_blk"]
    C_out, C_out_stored, Co_blk = layer["C_out"], layer["C_out_stored"], layer["Co_blk"]

    t_out = (T + 2 * pad - K) // s + 1
    n_tt = _cdiv(t_out, layer["t_cap"])
    t_tile = _round_up(_cdiv(t_out, n_tt), 16)
    t_out_pad = n_tt * t_tile
    t_win = t_tile + Kq - 1
    t_rows = t_out_pad + Kq - 1

    x = x.astype(compute_dtype)

    if layer["mode"] == "im2col":
        # (B, T, 1) -> per-tile im2col patches (B*n_tt, 1, t_tile, K).
        L_pad = t_out_pad + K - 1
        xp = jnp.pad(x[:, :, 0], ((0, 0), (pad, L_pad - T - pad)))
        idx = (jnp.arange(n_tt)[:, None, None] * t_tile
               + jnp.arange(t_tile)[None, :, None]
               + jnp.arange(K)[None, None, :])
        x_tiles = xp[:, idx].reshape(B * n_tt, 1, t_tile, K)
    else:
        # Zero-pad, phase-merge (free reshape when n_icb==1), channel-block split, window.
        L_pad = s * t_rows
        xp = jnp.pad(x, ((0, 0), (pad, L_pad - T - pad), (0, 0)))
        x_r = (xp.reshape(B, t_rows, s, n_icb, Ci_blk)
               .transpose(0, 3, 1, 2, 4)
               .reshape(B, n_icb, t_rows, CK))
        if n_tt == 1:
            x_tiles = x_r                                    # t_rows == t_win
        else:
            idx = jnp.arange(n_tt)[:, None] * t_tile + jnp.arange(t_win)[None, :]
            x_tiles = (x_r[:, :, idx, :]                     # (B, n_icb, n_tt, t_win, CK)
                       .transpose(0, 2, 1, 3, 4)
                       .reshape(B * n_tt, n_icb, t_win, CK))

    BT = B * n_tt
    if layer["grouped"]:
        x_map = lambda blk, bt: (bt, blk, 0, 0)
    else:
        x_map = lambda blk, bt: (bt, 0, 0, 0)

    kernel = functools.partial(_conv_block_kernel, t_tile=t_tile, kq=Kq,
                               slope=LRELU_SLOPE, apply_act=apply_act)

    out = pl.pallas_call(
        kernel,
        out_shape=jax.ShapeDtypeStruct((BT, t_tile, C_out_stored), out_dtype),
        grid_spec=pltpu.PrefetchScalarGridSpec(
            num_scalar_prefetch=0,
            # Channel-block axis outermost, BT innermost: the weight block index is
            # constant across consecutive steps -> weights stay resident in VMEM.
            grid=(n_blk, BT),
            in_specs=[
                pl.BlockSpec((None, None, t_win, CK), x_map),
                pl.BlockSpec((None, Kq, CK, Co_blk), lambda blk, bt: (blk, 0, 0, 0)),
                pl.BlockSpec((None, 1, Co_blk), lambda blk, bt: (blk, 0, 0)),
            ],
            out_specs=pl.BlockSpec((None, t_tile, Co_blk),
                                   lambda blk, bt: (bt, 0, blk)),
        ),
        compiler_params=pltpu.CompilerParams(
            dimension_semantics=("parallel", "parallel"),
            vmem_limit_bytes=_VMEM_LIMIT_BYTES,
        ),
    )(x_tiles, layer["W"], layer["bias"])

    return out.reshape(B, t_out_pad, C_out_stored)[:, :t_out, :C_out]


# ----------------------------------------------------------------------------- module
_CONV_CFG = [
    # (C_in, C_out, K, stride, groups, padding)
    (1, 16, 15, 1, 1, 7),
    (16, 64, 41, 4, 4, 20),
    (64, 256, 41, 4, 16, 20),
    (256, 1024, 41, 4, 64, 20),
    (1024, 1024, 41, 4, 256, 20),
    (1024, 1024, 5, 1, 1, 2),
]
_CONV_POST_CFG = (1024, 1, 3, 1, 1, 1)


def init_discriminator_s_params(key):
    """Deterministic synthetic raw parameters (weight_norm at init == plain conv)."""
    raw = {"convs": [], "conv_post": None}
    keys = jax.random.split(key, len(_CONV_CFG) + 1)
    for k, (cin, cout, ks, st, g, pad) in zip(keys[:-1], _CONV_CFG):
        kw, kb = jax.random.split(k)
        scale = 1.0 / float(ks * (cin // g)) ** 0.5
        w = scale * jax.random.normal(kw, (cout, cin // g, ks), jnp.float32)
        b = 0.1 * jax.random.normal(kb, (cout,), jnp.float32)
        raw["convs"].append((w, b, st, pad, g))
    cin, cout, ks, st, g, pad = _CONV_POST_CFG
    kw, kb = jax.random.split(keys[-1])
    scale = 1.0 / float(ks * (cin // g)) ** 0.5
    w = scale * jax.random.normal(kw, (cout, cin // g, ks), jnp.float32)
    b = 0.1 * jax.random.normal(kb, (cout,), jnp.float32)
    raw["conv_post"] = (w, b, st, pad, g)
    return raw


def prepare_params(raw):
    """One-time packing of weights (per channel block, phase-merged taps, bf16)."""
    packed = {"convs": [pack_conv_layer(w, b, st, pad, g)
                        for (w, b, st, pad, g) in raw["convs"]]}
    w, b, st, pad, g = raw["conv_post"]
    packed["conv_post"] = pack_conv_layer(w, b, st, pad, g)
    return packed


def discriminator_s_forward(packed, x_ncl):
    """Forward pass. x_ncl: (B, 1, T) PyTorch NCL layout -> (x_flat, fmap)."""
    x = jnp.transpose(x_ncl, (0, 2, 1))               # NCL -> NLC
    fmap = []
    for layer in packed["convs"]:
        x = conv1d_pallas(x, layer, apply_act=True, out_dtype=jnp.bfloat16)
        fmap.append(jnp.transpose(x, (0, 2, 1)))      # store NCL like PyTorch
    x = conv1d_pallas(x, packed["conv_post"], apply_act=False, out_dtype=jnp.float32)
    fmap.append(jnp.transpose(x, (0, 2, 1)))
    x_ncl_out = jnp.transpose(x, (0, 2, 1))           # (B, 1, t_out)
    x_flat = x_ncl_out.reshape(x_ncl_out.shape[0], -1)   # torch.flatten(x, 1, -1)
    return x_flat, fmap


# --------------------------------------------------------------------- pure-JAX reference
def _conv1d_ref(x_ncl, w, b, stride, padding, groups):
    out = jax.lax.conv_general_dilated(
        x_ncl.astype(jnp.bfloat16), w.astype(jnp.bfloat16),
        window_strides=(stride,), padding=[(padding, padding)],
        dimension_numbers=("NCH", "OIH", "NCH"), feature_group_count=groups,
        preferred_element_type=jnp.float32)
    return out + b[None, :, None]


def _forward_ref(raw, x_ncl):
    x = x_ncl
    fmap = []
    for (w, b, stride, pad, groups) in raw["convs"]:
        x = _conv1d_ref(x, w, b, stride, pad, groups)
        x = jnp.where(x > 0, x, LRELU_SLOPE * x)
        fmap.append(x)
    w, b, stride, pad, groups = raw["conv_post"]
    x = _conv1d_ref(x, w, b, stride, pad, groups)
    fmap.append(x)
    return x.reshape(x.shape[0], -1), fmap


def _assert_close(a, r, name, rtol=3e-2, atol=2e-3):
    assert a.shape == r.shape, f"{name}: shape {a.shape} vs {r.shape}"
    err = float(jnp.max(jnp.abs(a.astype(jnp.float32) - r.astype(jnp.float32))))
    scale = float(jnp.max(jnp.abs(r)))
    assert err <= rtol * scale + atol, f"{name}: err={err:.3e} scale={scale:.3e}"


def _check(packed, raw, x, tag):
    out, fmap = discriminator_s_forward(packed, x)
    out = jax.block_until_ready(out)
    fmap = [jax.block_until_ready(f) for f in fmap]
    out_ref, fmap_ref = _forward_ref(raw, x)
    _assert_close(out, out_ref, f"{tag}:out")
    for i, (a, r) in enumerate(zip(fmap, fmap_ref)):
        _assert_close(a, r, f"{tag}:fmap[{i}]")


# ----------------------------------------------------------------------------- main
if __name__ == "__main__":
    key = jax.random.PRNGKey(0)
    pkey, xkey = jax.random.split(key)
    raw_params = init_discriminator_s_params(pkey)
    packed_params = prepare_params(raw_params)

    # Check 1: small input (single time tile on every layer).  PyTorch NCL input (B, 1, T).
    x_small = jax.random.normal(xkey, (2, 1, 256), jnp.float32)
    _check(packed_params, raw_params, x_small, "small")

    # Check 2: long input so the multi-time-tile (windowed gather) path is exercised for
    # both the im2col (layer 0) and phase-merged poly (layer 1) modes.
    x_long = jax.random.normal(jax.random.PRNGKey(1), (1, 1, 16384), jnp.float32)
    _check(packed_params, raw_params, x_long, "long")

    print("KERNEL_OK")
</pallas_src>

<mosaic_0001>
module attributes {stable_mosaic.version = 11 : i64} {
  func.func @_conv_block_kernel(%arg0: i32, %arg1: i32, %arg2: memref<1x1x256x15xbf16, #tpu.memory_space<vmem>>, %arg3: memref<1x1x15x16xbf16, #tpu.memory_space<vmem>>, %arg4: memref<1x1x16xf32, #tpu.memory_space<vmem>>, %arg5: memref<1x256x16xbf16, #tpu.memory_space<vmem>>) attributes {dimension_semantics = [#tpu.dimension_semantics<parallel>, #tpu.dimension_semantics<parallel>], iteration_bounds = array<i64: 1, 2>, scalar_prefetch = 0 : i64, scratch_operands = 0 : i64, tpu.core_type = #tpu.core_type<tc>, window_params = [{transform_indices = @transform_0, window_bounds = array<i64: 1, 1, 256, 15>}, {transform_indices = @transform_1, window_bounds = array<i64: 1, 1, 15, 16>}, {transform_indices = @transform_2, window_bounds = array<i64: 1, 1, 16>}, {transform_indices = @transform_3, window_bounds = array<i64: 1, 256, 16>}]} {
    %c0 = arith.constant 0 : index
    %c0_0 = arith.constant 0 : index
    %c0_1 = arith.constant 0 : index
    %c0_2 = arith.constant 0 : index
    %0 = vector.load %arg2[%c0, %c0_0, %c0_1, %c0_2] : memref<1x1x256x15xbf16, #tpu.memory_space<vmem>>, vector<1x1x256x15xbf16>
    %1 = vector.shape_cast %0 : vector<1x1x256x15xbf16> to vector<256x15xbf16>
    %c0_3 = arith.constant 0 : index
    %c0_4 = arith.constant 0 : index
    %c0_5 = arith.constant 0 : index
    %c0_6 = arith.constant 0 : index
    %2 = vector.load %arg3[%c0_3, %c0_4, %c0_5, %c0_6] : memref<1x1x15x16xbf16, #tpu.memory_space<vmem>>, vector<1x1x15x16xbf16>
    %3 = vector.shape_cast %2 : vector<1x1x15x16xbf16> to vector<15x16xbf16>
    %cst = arith.constant dense<0.000000e+00> : vector<256x16xf32>
    %4 = tpu.matmul %1, %3, %cst {dimension_numbers = #tpu.dot_dimension_numbers<[1], [0], [0], [1], [0, 0, 1, 1], [], []>} : vector<256x15xbf16>, vector<15x16xbf16>, vector<256x16xf32> -> vector<256x16xf32>
    %c0_7 = arith.constant 0 : index
    %c0_8 = arith.constant 0 : index
    %c0_9 = arith.constant 0 : index
    %5 = vector.load %arg4[%c0_7, %c0_8, %c0_9] : memref<1x1x16xf32, #tpu.memory_space<vmem>>, vector<1x1x16xf32>
    %6 = vector.shape_cast %5 : vector<1x1x16xf32> to vector<1x16xf32>
    %7 = vector.broadcast %6 : vector<1x16xf32> to vector<256x16xf32>
    %8 = arith.addf %4, %7 : vector<256x16xf32>
    %cst_10 = arith.constant 0.000000e+00 : f32
    %9 = vector.broadcast %cst_10 : f32 to vector<256x16xf32>
    %10 = arith.cmpf ogt, %8, %9 : vector<256x16xf32>
    %cst_11 = arith.constant 1.000000e-01 : f32
    %11 = vector.broadcast %cst_11 : f32 to vector<256x16xf32>
    %12 = arith.mulf %11, %8 : vector<256x16xf32>
    %13 = arith.select %10, %8, %12 : vector<256x16xi1>, vector<256x16xf32>
    %14 = arith.truncf %13 : vector<256x16xf32> to vector<256x16xbf16>
    %c0_12 = arith.constant 0 : index
    %c0_13 = arith.constant 0 : index
    %c0_14 = arith.constant 0 : index
    %15 = vector.load %arg5[%c0_12, %c0_13, %c0_14] : memref<1x256x16xbf16, #tpu.memory_space<vmem>>, vector<1x256x16xbf16>
    %16 = vector.shape_cast %15 : vector<1x256x16xbf16> to vector<256x16xbf16>
    %17 = vector.shape_cast %14 : vector<256x16xbf16> to vector<1x256x16xbf16>
    tpu.vector_store %arg5[%c0_12, %c0_13, %c0_14], %17 {strides = array<i32>} : memref<1x256x16xbf16, #tpu.memory_space<vmem>>, vector<1x256x16xbf16>,
    return
  }
  func.func @transform_0(%arg0: i32, %arg1: i32) -> (i32, i32, i32, i32) {
    %c0_i32 = arith.constant 0 : i32
    %c0_i32_0 = arith.constant 0 : i32
    %c0_i32_1 = arith.constant 0 : i32
    %c0_i32_2 = arith.constant 0 : i32
    return %arg1, %c0_i32, %c0_i32_0, %c0_i32_1 : i32, i32, i32, i32
  }
  func.func @transform_1(%arg0: i32, %arg1: i32) -> (i32, i32, i32, i32) {
    %c0_i32 = arith.constant 0 : i32
    %c0_i32_0 = arith.constant 0 : i32
    %c0_i32_1 = arith.constant 0 : i32
    %c0_i32_2 = arith.constant 0 : i32
    return %arg0, %c0_i32, %c0_i32_0, %c0_i32_1 : i32, i32, i32, i32
  }
  func.func @transform_2(%arg0: i32, %arg1: i32) -> (i32, i32, i32) {
    %c0_i32 = arith.constant 0 : i32
    %c0_i32_0 = arith.constant 0 : i32
    %c0_i32_1 = arith.constant 0 : i32
    return %arg0, %c0_i32, %c0_i32_0 : i32, i32, i32
  }
  func.func @transform_3(%arg0: i32, %arg1: i32) -> (i32, i32, i32) {
    %c0_i32 = arith.constant 0 : i32
    %c0_i32_0 = arith.constant 0 : i32
    return %arg1, %c0_i32, %arg0 : i32, i32, i32
  }
}

</mosaic_0001>

<bundles_post_ra>
// kernel: tpu_custom_call.1
= control target key start
LH: loop header
LB: loop body
LE: loop exit
PB: predicated region body
PF: predicated region fallthrough
CT: control target
= control target key end

     0   :  { %s1184_s12 = smov 0   ;;  %s1186_s13 = smov 0   ;;  %s1366_s0 = inlined_call_operand.vmem [shape: bf16[2,1,256,15], index: 0, kind: input, shape index: {}]   ;;  %s1367_s1 = inlined_call_operand.vmem [shape: bf16[1,1,15,16], index: 1, kind: input, shape index: {}]   ;;  %s1368_s2 = inlined_call_operand.vmem [shape: f32[1,1,16], index: 2, kind: input, shape index: {}]   ;;  %s1369_s3 = inlined_call_operand.vmem [shape: bf16[2,256,16], index: 3, kind: output, shape index: {}]  }
   0x1   :  { %s1188_s14 = smov 0  }
   0x2 LB: > { %s22_s15 = sadd.s32 1, %s1157_s13  ;;  %p937_p0 = scmp.ge.s32.totalorder %s1161_s14, 1  ;;  %s1161_s14 = sphi %s1188_s14, %s13_s14   ;;  %s1157_s13 = sphi %s1186_s13, %s1371_s13   ;;  %s1153_s12 = sphi %s1184_s12, %s1370_s12  }
   0x3   : > { %p23_p1 = scmp.ge.s32.totalorder %s22_s15, 2  ;;  %p169_p2 = scmp.lt.s32.totalorder %s1161_s14, 3 }
   0x5   : > { %s1373_s15 = smov (%p23_p1, %s22_s15), 0  ;;  %p170_p3 = pnand %p937_p0, %p169_p2 }
   0x6   : > { %v1122_v0 = vld [vmem:[%s1367_s1] sm:$0xff] (!%p170_p3)   ;;  %vm401_vm0 = vcmask (!%p170_p3), 1046528   ;;  %vm402_vm1 = vcmask (!%p170_p3), 1047552   ;;  %p204_p4 = scmp.lt.s32.totalorder (!%p170_p3), %s1153_s12, 1  ;;  %v1163_v1 = vmov (!%p170_p3), 65535   ;;  %vm352_vm2 = vcmask (!%p170_p3), 121856  }
   0x7   : > { %173 = sbr.rel (%p170_p3) target bundleno = 277 (0x115), region = 32  ;;  %v403_v2 = vsel (!%p170_p3), %vm401_vm0, 4294967295, %v1163_v1  ;;  %v1250_v21 = vld [vmem:[%s1368_s2] ss:$0 sm:$0xff] (!%p170_p3)  ;;  %vm793_vm3 = vcmask (!%p170_p3), 125952  }
   0x8   : > { %v404_v3 = vsel (!%p170_p3), %vm402_vm1, %v403_v2, 0 }
   0x9   : > { %v406_v4 = vand.u32 (!%p170_p3), %v1122_v0, %v404_v3 }
   0xb   : > { %1061 = vmatprep.subr.bf16.mxu0 (!%p170_p3), %v406_v4  ;;  %1095 = vmatprep.subr.bf16.mxu1 (!%p170_p3), %v406_v4 }
   0xc   : > { %1062 = vmatpush3.bf16.msra.mxu0 (!%p170_p3), %v406_v4  ;;  %1096 = vmatpush3.bf16.msra.mxu1 (!%p170_p3), %v406_v4 }
   0xe   : > { %s1375_s12 = smov (!%p204_p4, %s1153_s12), 1 }
   0xf   : > { %s1010_s18 = sshll.u32 %s1375_s12, 7 }
  0x10   : > { %s1213_s21 = scalar_lea.vmem %s1366_s0, %s1010_s18  ;;  %s1262_s26 = scalar_lea.vmem %s1369_s3, %s1010_s18 }
  0x11   : > { %v1123_v5 = vld [vmem:[%s1213_s21] sm:$0xff]   ;;  %v1125_v7 = vld [vmem:[%s1213_s21 + $0x8] sm:$0xff]   ;;  %v1127_v9 = vld [vmem:[%s1213_s21 + $0x10] sm:$0xff]  }
  0x12   : > { %v1124_v6 = vld [vmem:[%s1213_s21 + $0x40] sm:$0xff]   ;;  %1063 = vmatprep.mubr.msk.bf16.mxu0 %vm352_vm2, %v1123_v5  ;;  %v1126_v8 = vld [vmem:[%s1213_s21 + $0x48] sm:$0xff]   ;;  %v1128_v10 = vld [vmem:[%s1213_s21 + $0x50] sm:$0xff]  }
  0x13   : > { %1079 = vmatprep.mubr.msk.bf16.mxu1 %vm352_vm2, %v1124_v6  ;;  %1064 = vmatmul.mubr.msk.bf16.vlgmr.msra.gmra.mrb[0].mxu0 %vm352_vm2, %v1125_v7  ;;  %v1129_v11 = vld [vmem:[%s1213_s21 + $0x18] sm:$0xff]   ;;  %v1131_v13 = vld [vmem:[%s1213_s21 + $0x20] sm:$0xff]   ;;  %v1133_v15 = vld [vmem:[%s1213_s21 + $0x28] sm:$0xff]  }
  0x14   : > { %1080 = vmatmul.mubr.msk.bf16.vlgmr.msra.gmra.mrb[0].mxu1 %vm352_vm2, %v1126_v8  ;;  %1067 = vmatprep.mubr.msk.bf16.mxu0 %vm352_vm2, %v1127_v9  ;;  %v1130_v12 = vld [vmem:[%s1213_s21 + $0x58] sm:$0xff]   ;;  %v1132_v14 = vld [vmem:[%s1213_s21 + $0x60] sm:$0xff]   ;;  %v1134_v16 = vld [vmem:[%s1213_s21 + $0x68] sm:$0xff]  }
  0x15   : > { %1083 = vmatprep.mubr.msk.bf16.mxu1 %vm352_vm2, %v1128_v10  ;;  %v1135_v17 = vld [vmem:[%s1213_s21 + $0x30] sm:$0xff]   ;;  %v1137_v19 = vld [vmem:[%s1213_s21 + $0x38] sm:$0xff]  }
  0x16   : > { %v1136_v18 = vld [vmem:[%s1213_s21 + $0x70] sm:$0xff]   ;;  %v1138_v20 = vld [vmem:[%s1213_s21 + $0x78] sm:$0xff]  }
  0x1b   : > { %1068 = vmatmul.mubr.msk.bf16.gmra.mrb[4].mxu0 %vm352_vm2, %v1129_v11 }
  0x1c   : > { %1084 = vmatmul.mubr.msk.bf16.gmra.mrb[4].mxu1 %vm352_vm2, %v1130_v12  ;;  %1071 = vmatprep.mubr.msk.bf16.mxu0 %vm352_vm2, %v1131_v13 }
  0x1d   : > { %1087 = vmatprep.mubr.msk.bf16.mxu1 %vm352_vm2, %v1132_v14 }
  0x23   : > { %1072 = vmatmul.mubr.msk.bf16.gmra.mrb[8].mxu0 %vm352_vm2, %v1133_v15 }
  0x24   : > { %1088 = vmatmul.mubr.msk.bf16.gmra.mrb[8].mxu1 %vm352_vm2, %v1134_v16  ;;  %1075 = vmatprep.mubr.msk.bf16.mxu0 %vm352_vm2, %v1135_v17 }
  0x25   : > { %1091 = vmatprep.mubr.msk.bf16.mxu1 %vm352_vm2, %v1136_v18 }
  0x2b   : > { %1076 = vmatmul.mubr.msk.bf16.gmra.mrb[12].mxu0 %vm352_vm2, %v1137_v19 }
  0x2c   : > { %1092 = vmatmul.mubr.msk.bf16.gmra.mrb[12].mxu1 %vm352_vm2, %v1138_v20 }
  0xe6   : > { %v1065_v22 = vpop.f32.mrb[0].mxu0 }
  0xe7   : > { %v451_v23 = vadd.f32 %v1065_v22, %v1250_v21  ;;  %v1081_v24 = vpop.f32.mrb[0].mxu1  ;;  %v442_v25 = vpop.f32.mrb[1].mxu0 }
  0xe8   : > { %v515_v26 = vadd.f32 %v1081_v24, %v1250_v21  ;;  %v443_v27 = vadd.f32 %v1250_v21, %v442_v25  ;;  %v506_v28 = vpop.f32.mrb[1].mxu1  ;;  %v1066_v29 = vpop.f32.mrb[2].mxu0 }
  0xe9   : > { %vm571_vm4 = vcmp.gt.f32.partialorder %v451_v23, 0.0  ;;  %v603_v30 = vmul.f32 0.1, %v451_v23  ;;  %v507_v31 = vadd.f32 %v1250_v21, %v506_v28  ;;  %v454_v32 = vadd.f32 %v1066_v29, %v1250_v21  ;;  %v1082_v33 = vpop.f32.mrb[2].mxu1  ;;  %v445_v34 = vpop.f32.mrb[3].mxu0 }
  0xea   : > { %vm587_vm5 = vcmp.gt.f32.partialorder %v515_v26, 0.0  ;;  %v619_v35 = vmul.f32 0.1, %v515_v26  ;;  %vm569_vm6 = vcmp.gt.f32.partialorder %v443_v27, 0.0  ;;  %v601_v36 = vmul.f32 0.1, %v443_v27 }
  0xeb   : > { %v635_v37 = vsel %vm571_vm4, %v451_v23, %v603_v30  ;;  %vm585_vm7 = vcmp.gt.f32.partialorder %v507_v31, 0.0  ;;  %v617_v38 = vmul.f32 0.1, %v507_v31  ;;  %vm572_vm8 = vcmp.gt.f32.partialorder %v454_v32, 0.0  ;;  %v509_v39 = vpop.f32.mrb[3].mxu1 }
  0xec   : > { %v1014_v40 = vpack.c.bf16 %v635_v37, %v635_v37  ;;  %v651_v41 = vsel %vm587_vm5, %v515_v26, %v619_v35  ;;  %v633_v42 = vsel %vm569_vm6, %v443_v27, %v601_v36  ;;  %v604_v43 = vmul.f32 0.1, %v454_v32 }
  0xed   : > { %v1030_v44 = vpack.c.bf16 %v651_v41, %v651_v41  ;;  %v1012_v45 = vpack.c.bf16 %v633_v42, %v633_v42  ;;  %v649_v46 = vsel %vm585_vm7, %v507_v31, %v617_v38  ;;  %v518_v47 = vadd.f32 %v1082_v33, %v1250_v21 }
  0xee   : > { %796 = vst.msk [vmem:[%s1262_s26 + $0x8] sm:$0xf] %vm793_vm3, %v1014_v40  ;;  %v1028_v48 = vpack.c.bf16 %v649_v46, %v649_v46  ;;  %v636_v49 = vsel %vm572_vm8, %v454_v32, %v604_v43  ;;  %v446_v50 = vadd.f32 %v1250_v21, %v445_v34  ;;  %v510_v51 = vadd.f32 %v1250_v21, %v509_v39  ;;  %v1069_v52 = vpop.f32.mrb[4].mxu0 }
  0xef   : > { %812 = vst.msk [vmem:[%s1262_s26 + $0x48] sm:$0xf] %vm793_vm3, %v1030_v44  ;;  %794 = vst.msk [vmem:[%s1262_s26] sm:$0xf] %vm793_vm3, %v1012_v45  ;;  %v1015_v53 = vpack.c.bf16 %v636_v49, %v636_v49  ;;  %vm588_vm9 = vcmp.gt.f32.partialorder %v518_v47, 0.0  ;;  %v467_v55 = vadd.f32 %v1069_v52, %v1250_v21  ;;  %v1085_v56 = vpop.f32.mrb[4].mxu1 }
  0xf0   : > { %v620_v54 = vmul.f32 0.1, %v518_v47  ;;  %v458_v57 = vpop.f32.mrb[5].mxu0  ;;  %810 = vst.msk [vmem:[%s1262_s26 + $0x40] sm:$0xf] %vm793_vm3, %v1028_v48  ;;  %vm570_vm10 = vcmp.gt.f32.partialorder %v446_v50, 0.0  ;;  %v531_v62 = vadd.f32 %v1085_v56, %v1250_v21 }
  0xf1   : > { %v602_v58 = vmul.f32 0.1, %v446_v50  ;;  %vm586_vm11 = vcmp.gt.f32.partialorder %v510_v51, 0.0  ;;  %v618_v59 = vmul.f32 0.1, %v510_v51  ;;  %vm575_vm12 = vcmp.gt.f32.partialorder %v467_v55, 0.0 }
  0xf2   : > { %797 = vst.msk [vmem:[%s1262_s26 + $0xc] sm:$0xf] %vm793_vm3, %v1015_v53  ;;  %v652_v60 = vsel %vm588_vm9, %v518_v47, %v620_v54  ;;  %v607_v61 = vmul.f32 0.1, %v467_v55  ;;  %v522_v63 = vpop.f32.mrb[5].mxu1  ;;  %v1070_v0 = vpop.f32.mrb[6].mxu0  ;;  %v459_v4 = vadd.f32 %v1250_v21, %v458_v57 }
  0xf3   : > { %v1031_v1 = vpack.c.bf16 %v652_v60, %v652_v60  ;;  %v634_v2 = vsel %vm570_vm10, %v446_v50, %v602_v58  ;;  %v650_v3 = vsel %vm586_vm11, %v510_v51, %v618_v59  ;;  %v1086_v5 = vpop.f32.mrb[6].mxu1  ;;  %v461_v6 = vpop.f32.mrb[7].mxu0  ;;  %vm591_vm13 = vcmp.gt.f32.partialorder %v531_v62, 0.0 }
  0xf4   : > { %v1013_v7 = vpack.c.bf16 %v634_v2, %v634_v2  ;;  %v1029_v8 = vpack.c.bf16 %v650_v3, %v650_v3  ;;  %v639_v9 = vsel %vm575_vm12, %v467_v55, %v607_v61  ;;  %v525_v10 = vpop.f32.mrb[7].mxu1  ;;  %v623_v12 = vmul.f32 0.1, %v531_v62 }
  0xf5   : > { %813 = vst.msk [vmem:[%s1262_s26 + $0x4c] sm:$0xf] %vm793_vm3, %v1031_v1  ;;  %v1018_v11 = vpack.c.bf16 %v639_v9, %v639_v9  ;;  %vm573_vm14 = vcmp.gt.f32.partialorder %v459_v4, 0.0  ;;  %v605_v13 = vmul.f32 0.1, %v459_v4  ;;  %v523_v14 = vadd.f32 %v1250_v21, %v522_v63 }
  0xf6   : > { %795 = vst.msk [vmem:[%s1262_s26 + $0x4] sm:$0xf] %vm793_vm3, %v1013_v7  ;;  %811 = vst.msk [vmem:[%s1262_s26 + $0x44] sm:$0xf] %vm793_vm3, %v1029_v8  ;;  %v470_v15 = vadd.f32 %v1070_v0, %v1250_v21  ;;  %v534_v16 = vadd.f32 %v1086_v5, %v1250_v21  ;;  %v462_v17 = vadd.f32 %v1250_v21, %v461_v6  ;;  %v1073_v22 = vpop.f32.mrb[8].mxu0 }
  0xf7   : > { %800 = vst.msk [vmem:[%s1262_s26 + $0x18] sm:$0xf] %vm793_vm3, %v1018_v11  ;;  %v655_v18 = vsel %vm591_vm13, %v531_v62, %v623_v12  ;;  %v637_v19 = vsel %vm573_vm14, %v459_v4, %v605_v13  ;;  %v526_v20 = vadd.f32 %v1250_v21, %v525_v10  ;;  %vm589_vm15 = vcmp.gt.f32.partialorder %v523_v14, 0.0  ;;  %v1089_v26 = vpop.f32.mrb[8].mxu1  ;;  %v474_v27 = vpop.f32.mrb[9].mxu0 }
  0xf8   : > { %v1034_v23 = vpack.c.bf16 %v655_v18, %v655_v18  ;;  %v1016_v24 = vpack.c.bf16 %v637_v19, %v637_v19  ;;  %v621_v25 = vmul.f32 0.1, %v523_v14  ;;  %vm576_vm0 = vcmp.gt.f32.partialorder %v470_v15, 0.0  ;;  %v538_v32 = vpop.f32.mrb[9].mxu1  ;;  %v1074_v33 = vpop.f32.mrb[10].mxu0 }
  0xf9   : > { %v608_v28 = vmul.f32 0.1, %v470_v15  ;;  %vm592_vm1 = vcmp.gt.f32.partialorder %v534_v16, 0.0  ;;  %v624_v29 = vmul.f32 0.1, %v534_v16  ;;  %vm574_vm2 = vcmp.gt.f32.partialorder %v462_v17, 0.0 }
  0xfa   : > { %816 = vst.msk [vmem:[%s1262_s26 + $0x58] sm:$0xf] %vm793_vm3, %v1034_v23  ;;  %798 = vst.msk [vmem:[%s1262_s26 + $0x10] sm:$0xf] %vm793_vm3, %v1016_v24  ;;  %v653_v30 = vsel %vm589_vm15, %v523_v14, %v621_v25  ;;  %v606_v31 = vmul.f32 0.1, %v462_v17  ;;  %v483_v43 = vadd.f32 %v1073_v22, %v1250_v21  ;;  %v547_v47 = vadd.f32 %v1089_v26, %v1250_v21 }
  0xfb   : > { %vm590_vm4 = vcmp.gt.f32.partialorder %v526_v20, 0.0  ;;  %v1032_v34 = vpack.c.bf16 %v653_v30, %v653_v30  ;;  %v640_v35 = vsel %vm576_vm0, %v470_v15, %v608_v28  ;;  %v656_v36 = vsel %vm592_vm1, %v534_v16, %v624_v29  ;;  %v1090_v38 = vpop.f32.mrb[10].mxu1  ;;  %v477_v39 = vpop.f32.mrb[11].mxu0 }
  0xfc   : > { %v622_v37 = vmul.f32 0.1, %v526_v20  ;;  %v1019_v40 = vpack.c.bf16 %v640_v35, %v640_v35  ;;  %v1035_v41 = vpack.c.bf16 %v656_v36, %v656_v36  ;;  %v638_v42 = vsel %vm574_vm2, %v462_v17, %v606_v31  ;;  %v541_v44 = vpop.f32.mrb[11].mxu1 }
  0xfd   : > { %814 = vst.msk [vmem:[%s1262_s26 + $0x50] sm:$0xf] %vm793_vm3, %v1032_v34  ;;  %v1017_v45 = vpack.c.bf16 %v638_v42, %v638_v42  ;;  %v475_v48 = vadd.f32 %v1250_v21, %v474_v27  ;;  %vm579_vm5 = vcmp.gt.f32.partialorder %v483_v43, 0.0  ;;  %v611_v50 = vmul.f32 0.1, %v483_v43 }
  0xfe   : > { %v654_v46 = vsel %vm590_vm4, %v526_v20, %v622_v37  ;;  %801 = vst.msk [vmem:[%s1262_s26 + $0x1c] sm:$0xf] %vm793_vm3, %v1019_v40  ;;  %817 = vst.msk [vmem:[%s1262_s26 + $0x5c] sm:$0xf] %vm793_vm3, %v1035_v41  ;;  %v539_v51 = vadd.f32 %v1250_v21, %v538_v32  ;;  %vm595_vm6 = vcmp.gt.f32.partialorder %v547_v47, 0.0  ;;  %v486_v56 = vadd.f32 %v1074_v33, %v1250_v21  ;;  %v1077_v57 = vpop.f32.mrb[12].mxu0 }
  0xff   : > { %v1033_v49 = vpack.c.bf16 %v654_v46, %v654_v46  ;;  %799 = vst.msk [vmem:[%s1262_s26 + $0x14] sm:$0xf] %vm793_vm3, %v1017_v45  ;;  %v627_v52 = vmul.f32 0.1, %v547_v47  ;;  %vm577_vm7 = vcmp.gt.f32.partialorder %v475_v48, 0.0  ;;  %v643_v54 = vsel %vm579_vm5, %v483_v43, %v611_v50  ;;  %v1093_v58 = vpop.f32.mrb[12].mxu1 }
 0x100   : > { %v609_v53 = vmul.f32 0.1, %v475_v48  ;;  %vm593_vm8 = vcmp.gt.f32.partialorder %v539_v51, 0.0  ;;  %v625_v55 = vmul.f32 0.1, %v539_v51  ;;  %v1022_v59 = vpack.c.bf16 %v643_v54, %v643_v54  ;;  %v490_v63 = vpop.f32.mrb[13].mxu0 }
 0x101   : > { %815 = vst.msk [vmem:[%s1262_s26 + $0x54] sm:$0xf] %vm793_vm3, %v1033_v49  ;;  %v659_v60 = vsel %vm595_vm6, %v547_v47, %v627_v52  ;;  %v550_v62 = vadd.f32 %v1090_v38, %v1250_v21  ;;  %v554_v0 = vpop.f32.mrb[13].mxu1  ;;  %vm580_vm9 = vcmp.gt.f32.partialorder %v486_v56, 0.0  ;;  %v1078_v4 = vpop.f32.mrb[14].mxu0  ;;  %v478_v10 = vadd.f32 %v1250_v21, %v477_v39 }
 0x102   : > { %v641_v61 = vsel %vm577_vm7, %v475_v48, %v609_v53  ;;  %v1038_v1 = vpack.c.bf16 %v659_v60, %v659_v60  ;;  %v657_v3 = vsel %vm593_vm8, %v539_v51, %v625_v55  ;;  %v1094_v5 = vpop.f32.mrb[14].mxu1  ;;  %804 = vst.msk [vmem:[%s1262_s26 + $0x28] sm:$0xf] %vm793_vm3, %v1022_v59  ;;  %v612_v7 = vmul.f32 0.1, %v486_v56  ;;  %v493_v9 = vpop.f32.mrb[15].mxu0 }
 0x103   : > { %v1020_v2 = vpack.c.bf16 %v641_v61, %v641_v61  ;;  %v1036_v6 = vpack.c.bf16 %v657_v3, %v657_v3  ;;  %vm596_vm10 = vcmp.gt.f32.partialorder %v550_v62, 0.0  ;;  %v628_v8 = vmul.f32 0.1, %v550_v62  ;;  %v557_v14 = vpop.f32.mrb[15].mxu1 }
 0x104   : > { %820 = vst.msk [vmem:[%s1262_s26 + $0x68] sm:$0xf] %vm793_vm3, %v1038_v1  ;;  %v542_v11 = vadd.f32 %v1250_v21, %v541_v44  ;;  %v499_v12 = vadd.f32 %v1077_v57, %v1250_v21  ;;  %v563_v13 = vadd.f32 %v1093_v58, %v1250_v21  ;;  %v644_v15 = vsel %vm580_vm9, %v486_v56, %v612_v7 }
 0x105   : > { %802 = vst.msk [vmem:[%s1262_s26 + $0x20] sm:$0xf] %vm793_vm3, %v1020_v2  ;;  %818 = vst.msk [vmem:[%s1262_s26 + $0x60] sm:$0xf] %vm793_vm3, %v1036_v6  ;;  %v660_v16 = vsel %vm596_vm10, %v550_v62, %v628_v8  ;;  %v491_v17 = vadd.f32 %v1250_v21, %v490_v63  ;;  %v555_v18 = vadd.f32 %v1250_v21, %v554_v0  ;;  %vm578_vm11 = vcmp.gt.f32.partialorder %v478_v10, 0.0 }
 0x106   : > { %v1023_v19 = vpack.c.bf16 %v644_v15, %v644_v15  ;;  %v1039_v20 = vpack.c.bf16 %v660_v16, %v660_v16  ;;  %v610_v22 = vmul.f32 0.1, %v478_v10  ;;  %vm594_vm12 = vcmp.gt.f32.partialorder %v542_v11, 0.0 }
 0x107   : > { %v626_v23 = vmul.f32 0.1, %v542_v11  ;;  %vm583_vm13 = vcmp.gt.f32.partialorder %v499_v12, 0.0  ;;  %v615_v24 = vmul.f32 0.1, %v499_v12  ;;  %vm599_vm14 = vcmp.gt.f32.partialorder %v563_v13, 0.0 }
 0x108   : > { %805 = vst.msk [vmem:[%s1262_s26 + $0x2c] sm:$0xf] %vm793_vm3, %v1023_v19  ;;  %821 = vst.msk [vmem:[%s1262_s26 + $0x6c] sm:$0xf] %vm793_vm3, %v1039_v20  ;;  %v642_v25 = vsel %vm578_vm11, %v478_v10, %v610_v22  ;;  %v631_v26 = vmul.f32 0.1, %v563_v13  ;;  %v502_v37 = vadd.f32 %v1078_v4, %v1250_v21  ;;  %v566_v39 = vadd.f32 %v1094_v5, %v1250_v21 }
 0x109   : > { %vm581_vm15 = vcmp.gt.f32.partialorder %v491_v17, 0.0  ;;  %v1021_v27 = vpack.c.bf16 %v642_v25, %v642_v25  ;;  %v658_v28 = vsel %vm594_vm12, %v542_v11, %v626_v23  ;;  %v647_v29 = vsel %vm583_vm13, %v499_v12, %v615_v24 }
 0x10a   : > { %v613_v30 = vmul.f32 0.1, %v491_v17  ;;  %v1037_v31 = vpack.c.bf16 %v658_v28, %v658_v28  ;;  %v1026_v32 = vpack.c.bf16 %v647_v29, %v647_v29  ;;  %v663_v33 = vsel %vm599_vm14, %v563_v13, %v631_v26 }
 0x10b   : > { %vm597_vm0 = vcmp.gt.f32.partialorder %v555_v18, 0.0  ;;  %803 = vst.msk [vmem:[%s1262_s26 + $0x24] sm:$0xf] %vm793_vm3, %v1021_v27  ;;  %v1042_v34 = vpack.c.bf16 %v663_v33, %v663_v33  ;;  %v629_v36 = vmul.f32 0.1, %v555_v18  ;;  %v494_v40 = vadd.f32 %v1250_v21, %v493_v9 }
 0x10c   : > { %v645_v35 = vsel %vm581_vm15, %v491_v17, %v613_v30  ;;  %819 = vst.msk [vmem:[%s1262_s26 + $0x64] sm:$0xf] %vm793_vm3, %v1037_v31  ;;  %808 = vst.msk [vmem:[%s1262_s26 + $0x38] sm:$0xf] %vm793_vm3, %v1026_v32  ;;  %v558_v41 = vadd.f32 %v1250_v21, %v557_v14  ;;  %vm584_vm1 = vcmp.gt.f32.partialorder %v502_v37, 0.0  ;;  %vm600_vm2 = vcmp.gt.f32.partialorder %v566_v39, 0.0 }
 0x10d   : > { %v1024_v38 = vpack.c.bf16 %v645_v35, %v645_v35  ;;  %824 = vst.msk [vmem:[%s1262_s26 + $0x78] sm:$0xf] %vm793_vm3, %v1042_v34  ;;  %v661_v42 = vsel %vm597_vm0, %v555_v18, %v629_v36  ;;  %v616_v43 = vmul.f32 0.1, %v502_v37  ;;  %v632_v45 = vmul.f32 0.1, %v566_v39 }
 0x10e   : > { %v1040_v44 = vpack.c.bf16 %v661_v42, %v661_v42  ;;  %vm582_vm4 = vcmp.gt.f32.partialorder %v494_v40, 0.0  ;;  %v614_v47 = vmul.f32 0.1, %v494_v40  ;;  %vm598_vm5 = vcmp.gt.f32.partialorder %v558_v41, 0.0 }
 0x10f   : > { %806 = vst.msk [vmem:[%s1262_s26 + $0x30] sm:$0xf] %vm793_vm3, %v1024_v38  ;;  %v648_v46 = vsel %vm584_vm1, %v502_v37, %v616_v43  ;;  %v630_v48 = vmul.f32 0.1, %v558_v41  ;;  %v664_v49 = vsel %vm600_vm2, %v566_v39, %v632_v45 }
 0x110   : > { %822 = vst.msk [vmem:[%s1262_s26 + $0x70] sm:$0xf] %vm793_vm3, %v1040_v44  ;;  %v1027_v21 = vpack.c.bf16 %v648_v46, %v648_v46  ;;  %v1043_v50 = vpack.c.bf16 %v664_v49, %v664_v49  ;;  %v646_v51 = vsel %vm582_vm4, %v494_v40, %v614_v47 }
 0x111   : > { %v662_v52 = vsel %vm598_vm5, %v558_v41, %v630_v48  ;;  %v1025_v53 = vpack.c.bf16 %v646_v51, %v646_v51 }
 0x112   : > { %809 = vst.msk [vmem:[%s1262_s26 + $0x3c] sm:$0xf] %vm793_vm3, %v1027_v21  ;;  %v1041_v54 = vpack.c.bf16 %v662_v52, %v662_v52  ;;  %825 = vst.msk [vmem:[%s1262_s26 + $0x7c] sm:$0xf] %vm793_vm3, %v1043_v50 }
 0x113   : > { %807 = vst.msk [vmem:[%s1262_s26 + $0x34] sm:$0xf] %vm793_vm3, %v1025_v53 }
 0x114   : > { %823 = vst.msk [vmem:[%s1262_s26 + $0x74] sm:$0xf] %vm793_vm3, %v1041_v54 }
 0x115 PF: > { %s13_s14 = sadd.s32 1, %s1161_s14   ;;  %s1370_s12 = smov %s1157_s13 }
 0x116   : > { %p10_p5 = scmp.ge.s32.totalorder %s13_s14, 4   ;;  %s1371_s13 = smov %s1373_s15 }
 0x118   :  { %12 = sbr.rel (!%p10_p5) target bundleno = 2 (0x2), region = 68 }

</bundles_post_ra>
